<compile_context>
chip_gen: v7x
topology: tpu7x:2x2x1
jax: 0.10.0
libtpu: 0.0.40
codegen_flags: <defaults>
</compile_context>

<pallas_src>
import jax
import jax.numpy as jnp
from jax.experimental import pallas as pl
from jax.experimental.pallas import tpu as pltpu


def _round_up(x, m):
    return ((x + m - 1) // m) * m


def _next_pow2(n):
    return 1 << (int(n) - 1).bit_length()


def _ae_kernel(x_ref,
               w1_ref, b1_ref,
               w2_ref, b2_ref,
               w3_ref, b3_ref,
               w4_ref, b4_ref,
               o_ref):
    """One batch-row tile of the full 4-layer autoencoder forward pass."""
    x = x_ref[...].astype(jnp.float32)

    # layer 1: ReLU(x @ W1 + b1)
    h = jnp.dot(x, w1_ref[...], preferred_element_type=jnp.float32) + b1_ref[...]
    h = jnp.maximum(h, 0.0)

    # layer 2
    h = jnp.dot(h, w2_ref[...], preferred_element_type=jnp.float32) + b2_ref[...]
    h = jnp.maximum(h, 0.0)

    # layer 3
    h = jnp.dot(h, w3_ref[...], preferred_element_type=jnp.float32) + b3_ref[...]
    h = jnp.maximum(h, 0.0)

    # layer 4 + sigmoid.  Single EUP transcendental per element:
    #   sigmoid(z) == 0.5 * tanh(0.5 * z) + 0.5   (exact identity)
    # (was exp + approx reciprocal = 2 EUP pushes; also avoids exp(-z)
    # overflow and the ~1e-3 approx-reciprocal error).
    z = jnp.dot(h, w4_ref[...], preferred_element_type=jnp.float32) + b4_ref[...]
    o_ref[...] = (0.5 * jnp.tanh(0.5 * z) + 0.5).astype(o_ref.dtype)


def _block_diag(w, p):
    """Block-diagonal stack of p copies of w: (in, out) -> (p*in, p*out)."""
    if p == 1:
        return w
    d_in, d_out = w.shape
    eye = jnp.eye(p, dtype=w.dtype)
    bd = eye[:, :, None, None] * w[None, None, :, :]          # (p, p, in, out)
    return bd.transpose(0, 2, 1, 3).reshape(p * d_in, p * d_out)


def _plain_forward(x, params):
    """Plain-JAX forward (reference, and remainder-rows path)."""
    f32 = jnp.float32
    h = x.astype(f32)
    for (w, b) in params[:-1]:
        h = jnp.maximum(h @ w.astype(f32) + b.astype(f32).reshape(1, -1), 0.0)
    w, b = params[-1]
    return jax.nn.sigmoid(h @ w.astype(f32) + b.astype(f32).reshape(1, -1))


def default_ae_forward(x, params, *, batch_tile=16384):
    """Run the DefaultAE forward pass with a Pallas TPU kernel.

    x:          (B, n_in)   f32 or bf16 (output dtype follows x; bf16 halves
                            HBM traffic on this bandwidth-bound op)
    params:     list of 4 (W, b) tuples, W: (in, out), b: (1, out)
    batch_tile: target samples per grid step.  Default 16384 gives ~1-2 MB
                f32 x/o blocks (roofline plateau on v5e/v6e/v7x); sweep
                8K-32K for very large batches.
    """
    B, n_in = x.shape
    f32 = jnp.float32
    out_dtype = x.dtype
    itemsize = jnp.dtype(out_dtype).itemsize

    # ---- lane packing: keep every block 128-lane dense ---------------------
    # `pack` consecutive samples share one 128-lane row.  If n_in does not
    # divide 128, zero-pad features to the next power of two (<=128) or to a
    # multiple of 128 so the output store is never a masked <128-lane vst.
    if n_in <= 128:
        f_pad = _next_pow2(n_in)
        pack = 128 // f_pad
    else:
        f_pad = _round_up(n_in, 128)
        pack = 1
    lane = pack * f_pad

    # ---- prepare (tiny) packed weights once, outside the kernel ------------
    (w1, b1), (w2, b2), (w3, b3), (w4, b4) = [
        (w.astype(f32), b.astype(f32).reshape(1, -1)) for (w, b) in params]
    if f_pad != n_in:
        w1 = jnp.pad(w1, ((0, f_pad - n_in), (0, 0)))   # zero rows: exact
        w4 = jnp.pad(w4, ((0, 0), (0, f_pad - n_in)))   # zero cols: sliced off
        b4 = jnp.pad(b4, ((0, 0), (0, f_pad - n_in)))
    packed = []
    for (w, b) in ((w1, b1), (w2, b2), (w3, b3), (w4, b4)):
        packed.append((_block_diag(w, pack), jnp.tile(b, (1, pack))))
    (w1p, b1p), (w2p, b2p), (w3p, b3p), (w4p, b4p) = packed

    # ---- split the batch: bulk (multiple of `pack`) via the kernel, and a
    # ---- tiny ragged tail (< pack samples) via plain JAX --------------------
    # This replaces the previous full-array jnp.pad: when B % pack == 0 the
    # kernel path below is completely copy-free (row-major reshape only).
    B_main = (B // pack) * pack
    r = B - B_main

    tail_out = None
    if r > 0:
        tail_out = _plain_forward(x[B_main:], params).astype(out_dtype)
    if B_main == 0:
        return tail_out

    x_main = x[:B_main] if r > 0 else x
    if f_pad != n_in:
        # Fallback path only (n_in does not divide 128): feature zero-pad.
        x_main = jnp.pad(x_main, ((0, 0), (0, f_pad - n_in)))
    rows = B_main // pack
    x_main = x_main.reshape(rows, lane)                  # row-major: free

    # ---- batch tiling -------------------------------------------------------
    sub = 16 if itemsize < 4 else 8                      # bf16-native sublanes
    rows_per_tile = max(sub, _round_up(max(1, batch_tile // pack), sub))
    rows_per_tile = min(rows_per_tile, _round_up(rows, sub))
    # Keep >= ~8 pipeline steps on large batches (dual-TC v7x sharding +
    # pipeline warm-up) without ever shrinking tiles below ~512 rows.
    if rows > 8 * 512:
        rows_per_tile = min(rows_per_tile, _round_up(pl.cdiv(rows, 8), sub))
    grid = (pl.cdiv(rows, rows_per_tile),)               # partial last block OK

    # ---- VMEM budget: x/o double-buffered + f32 temporaries + weights ------
    io_bytes = 4 * rows_per_tile * lane * itemsize       # 2 bufs each for x, o
    tmp_bytes = 6 * rows_per_tile * lane * 4             # generous f32 temps
    w_bytes = 2 * sum(int(a.size) * 4
                      for a in (w1p, b1p, w2p, b2p, w3p, b3p, w4p, b4p))
    vmem_limit = int(min(max(io_bytes + tmp_bytes + w_bytes + (8 << 20),
                             32 << 20),
                         48 << 20))                      # safe under v7x 64 MiB

    def const_spec(arr):
        # Weights/biases: constant index every step and tiny (<~100 KB packed),
        # so default double-buffering costs negligible VMEM.
        return pl.BlockSpec(arr.shape, lambda i: (0, 0))

    in_specs = [
        pl.BlockSpec((rows_per_tile, lane), lambda i: (i, 0)),
        const_spec(w1p), const_spec(b1p),
        const_spec(w2p), const_spec(b2p),
        const_spec(w3p), const_spec(b3p),
        const_spec(w4p), const_spec(b4p),
    ]
    out_spec = pl.BlockSpec((rows_per_tile, lane), lambda i: (i, 0))

    out_main = pl.pallas_call(
        _ae_kernel,
        out_shape=jax.ShapeDtypeStruct((rows, lane), out_dtype),
        grid_spec=pltpu.PrefetchScalarGridSpec(
            num_scalar_prefetch=0,
            grid=grid,
            in_specs=in_specs,
            out_specs=out_spec,
        ),
        compiler_params=pltpu.CompilerParams(
            dimension_semantics=("parallel",),            # megacore / dual-TC
            vmem_limit_bytes=vmem_limit,
        ),
    )(x_main, w1p, b1p, w2p, b2p, w3p, b3p, w4p, b4p)

    out_main = out_main.reshape(B_main, f_pad)
    if f_pad != n_in:
        out_main = out_main[:, :n_in]                     # drop padded features
    if r > 0:
        return jnp.concatenate([out_main, tail_out], axis=0)
    return out_main


def init_default_ae_params(key, n_in, hidden=(10, 2, 10)):
    """Deterministic parameter init (uniform, same shapes/range as nn.Linear)."""
    dims = [n_in, *hidden, n_in]
    params = []
    for d_in, d_out in zip(dims[:-1], dims[1:]):
        key, kw, kb = jax.random.split(key, 3)
        bound = 1.0 / jnp.sqrt(jnp.float32(d_in))
        w = jax.random.uniform(kw, (d_in, d_out), jnp.float32, -bound, bound)
        b = jax.random.uniform(kb, (1, d_out), jnp.float32, -bound, bound)
        params.append((w, b))
    return params


if __name__ == "__main__":
    key = jax.random.PRNGKey(0)
    kx, kp, kx2, kp2 = jax.random.split(key, 4)

    # --- test 1: f32, n_in divides 128 (pack=4), ragged batch (50 = 48 + 2) --
    n_in = 32
    batch = 50
    x = jax.random.normal(kx, (batch, n_in), jnp.float32)
    params = init_default_ae_params(kp, n_in)
    out = jax.block_until_ready(default_ae_forward(x, params, batch_tile=32))
    ref = _plain_forward(x, params)
    assert out.shape == (batch, n_in)
    err = float(jnp.max(jnp.abs(out.astype(jnp.float32) - ref)))
    assert err < 2e-3, f"f32 packed path mismatch: max abs err = {err}"

    # --- test 2: bf16 I/O (halves HBM traffic), divisible batch (zero-copy) --
    xb = x[:48].astype(jnp.bfloat16)
    out_b = jax.block_until_ready(default_ae_forward(xb, params, batch_tile=64))
    ref_b = _plain_forward(xb.astype(jnp.float32), params)
    assert out_b.shape == (48, n_in)
    err_b = float(jnp.max(jnp.abs(out_b.astype(jnp.float32) - ref_b)))
    assert err_b < 2e-2, f"bf16 path mismatch: max abs err = {err_b}"

    # --- test 3: n_in that does NOT divide 128 -> lane-dense feature-pad path -
    n_in2 = 20
    x2 = jax.random.normal(kx2, (37, n_in2), jnp.float32)
    params2 = init_default_ae_params(kp2, n_in2)
    out2 = jax.block_until_ready(default_ae_forward(x2, params2, batch_tile=32))
    ref2 = _plain_forward(x2, params2)
    assert out2.shape == (37, n_in2)
    err2 = float(jnp.max(jnp.abs(out2.astype(jnp.float32) - ref2)))
    assert err2 < 2e-3, f"feature-pad path mismatch: max abs err = {err2}"

    print("KERNEL_OK")
</pallas_src>

<mosaic_0001>
module attributes {stable_mosaic.version = 11 : i64} {
  func.func @_ae_kernel(%arg0: i32, %arg1: memref<8x128xf32, #tpu.memory_space<vmem>>, %arg2: memref<128x40xf32, #tpu.memory_space<vmem>>, %arg3: memref<1x40xf32, #tpu.memory_space<vmem>>, %arg4: memref<40x8xf32, #tpu.memory_space<vmem>>, %arg5: memref<1x8xf32, #tpu.memory_space<vmem>>, %arg6: memref<8x40xf32, #tpu.memory_space<vmem>>, %arg7: memref<1x40xf32, #tpu.memory_space<vmem>>, %arg8: memref<40x128xf32, #tpu.memory_space<vmem>>, %arg9: memref<1x128xf32, #tpu.memory_space<vmem>>, %arg10: memref<8x128xf32, #tpu.memory_space<vmem>>) attributes {dimension_semantics = [#tpu.dimension_semantics<parallel>], iteration_bounds = array<i64: 2>, scalar_prefetch = 0 : i64, scratch_operands = 0 : i64, tpu.core_type = #tpu.core_type<tc>, window_params = [{transform_indices = @transform_0, window_bounds = array<i64: 8, 128>}, {pipeline_mode = #tpu.pipeline_mode<synchronous>, transform_indices = @transform_1, window_bounds = array<i64: 128, 40>}, {pipeline_mode = #tpu.pipeline_mode<synchronous>, transform_indices = @transform_2, window_bounds = array<i64: 1, 40>}, {pipeline_mode = #tpu.pipeline_mode<synchronous>, transform_indices = @transform_3, window_bounds = array<i64: 40, 8>}, {pipeline_mode = #tpu.pipeline_mode<synchronous>, transform_indices = @transform_4, window_bounds = array<i64: 1, 8>}, {pipeline_mode = #tpu.pipeline_mode<synchronous>, transform_indices = @transform_5, window_bounds = array<i64: 8, 40>}, {pipeline_mode = #tpu.pipeline_mode<synchronous>, transform_indices = @transform_6, window_bounds = array<i64: 1, 40>}, {pipeline_mode = #tpu.pipeline_mode<synchronous>, transform_indices = @transform_7, window_bounds = array<i64: 40, 128>}, {pipeline_mode = #tpu.pipeline_mode<synchronous>, transform_indices = @transform_8, window_bounds = array<i64: 1, 128>}, {transform_indices = @transform_9, window_bounds = array<i64: 8, 128>}]} {
    %c0 = arith.constant 0 : index
    %c0_0 = arith.constant 0 : index
    %0 = vector.load %arg1[%c0, %c0_0] : memref<8x128xf32, #tpu.memory_space<vmem>>, vector<8x128xf32>
    %c0_1 = arith.constant 0 : index
    %c0_2 = arith.constant 0 : index
    %1 = vector.load %arg2[%c0_1, %c0_2] : memref<128x40xf32, #tpu.memory_space<vmem>>, vector<128x40xf32>
    %cst = arith.constant dense<0.000000e+00> : vector<8x40xf32>
    %2 = tpu.matmul %0, %1, %cst {dimension_numbers = #tpu.dot_dimension_numbers<[1], [0], [0], [1], [0, 0, 1, 1], [], []>} : vector<8x128xf32>, vector<128x40xf32>, vector<8x40xf32> -> vector<8x40xf32>
    %c0_3 = arith.constant 0 : index
    %c0_4 = arith.constant 0 : index
    %3 = vector.load %arg3[%c0_3, %c0_4] : memref<1x40xf32, #tpu.memory_space<vmem>>, vector<1x40xf32>
    %4 = vector.broadcast %3 : vector<1x40xf32> to vector<8x40xf32>
    %5 = arith.addf %2, %4 : vector<8x40xf32>
    %cst_5 = arith.constant 0.000000e+00 : f32
    %6 = vector.broadcast %cst_5 : f32 to vector<8x40xf32>
    %7 = arith.maximumf %5, %6 : vector<8x40xf32>
    %c0_6 = arith.constant 0 : index
    %c0_7 = arith.constant 0 : index
    %8 = vector.load %arg4[%c0_6, %c0_7] : memref<40x8xf32, #tpu.memory_space<vmem>>, vector<40x8xf32>
    %cst_8 = arith.constant dense<0.000000e+00> : vector<8x8xf32>
    %9 = tpu.matmul %7, %8, %cst_8 {dimension_numbers = #tpu.dot_dimension_numbers<[1], [0], [0], [1], [0, 0, 1, 1], [], []>} : vector<8x40xf32>, vector<40x8xf32>, vector<8x8xf32> -> vector<8x8xf32>
    %c0_9 = arith.constant 0 : index
    %c0_10 = arith.constant 0 : index
    %10 = vector.load %arg5[%c0_9, %c0_10] : memref<1x8xf32, #tpu.memory_space<vmem>>, vector<1x8xf32>
    %11 = vector.broadcast %10 : vector<1x8xf32> to vector<8x8xf32>
    %12 = arith.addf %9, %11 : vector<8x8xf32>
    %cst_11 = arith.constant 0.000000e+00 : f32
    %13 = vector.broadcast %cst_11 : f32 to vector<8x8xf32>
    %14 = arith.maximumf %12, %13 : vector<8x8xf32>
    %c0_12 = arith.constant 0 : index
    %c0_13 = arith.constant 0 : index
    %15 = vector.load %arg6[%c0_12, %c0_13] : memref<8x40xf32, #tpu.memory_space<vmem>>, vector<8x40xf32>
    %cst_14 = arith.constant dense<0.000000e+00> : vector<8x40xf32>
    %16 = tpu.matmul %14, %15, %cst_14 {dimension_numbers = #tpu.dot_dimension_numbers<[1], [0], [0], [1], [0, 0, 1, 1], [], []>} : vector<8x8xf32>, vector<8x40xf32>, vector<8x40xf32> -> vector<8x40xf32>
    %c0_15 = arith.constant 0 : index
    %c0_16 = arith.constant 0 : index
    %17 = vector.load %arg7[%c0_15, %c0_16] : memref<1x40xf32, #tpu.memory_space<vmem>>, vector<1x40xf32>
    %18 = vector.broadcast %17 : vector<1x40xf32> to vector<8x40xf32>
    %19 = arith.addf %16, %18 : vector<8x40xf32>
    %cst_17 = arith.constant 0.000000e+00 : f32
    %20 = vector.broadcast %cst_17 : f32 to vector<8x40xf32>
    %21 = arith.maximumf %19, %20 : vector<8x40xf32>
    %c0_18 = arith.constant 0 : index
    %c0_19 = arith.constant 0 : index
    %22 = vector.load %arg8[%c0_18, %c0_19] : memref<40x128xf32, #tpu.memory_space<vmem>>, vector<40x128xf32>
    %cst_20 = arith.constant dense<0.000000e+00> : vector<8x128xf32>
    %23 = tpu.matmul %21, %22, %cst_20 {dimension_numbers = #tpu.dot_dimension_numbers<[1], [0], [0], [1], [0, 0, 1, 1], [], []>} : vector<8x40xf32>, vector<40x128xf32>, vector<8x128xf32> -> vector<8x128xf32>
    %c0_21 = arith.constant 0 : index
    %c0_22 = arith.constant 0 : index
    %24 = vector.load %arg9[%c0_21, %c0_22] : memref<1x128xf32, #tpu.memory_space<vmem>>, vector<1x128xf32>
    %25 = vector.broadcast %24 : vector<1x128xf32> to vector<8x128xf32>
    %26 = arith.addf %23, %25 : vector<8x128xf32>
    %cst_23 = arith.constant 5.000000e-01 : f32
    %27 = vector.broadcast %cst_23 : f32 to vector<8x128xf32>
    %28 = arith.mulf %27, %26 : vector<8x128xf32>
    %29 = math.tanh %28 : vector<8x128xf32>
    %cst_24 = arith.constant 5.000000e-01 : f32
    %30 = vector.broadcast %cst_24 : f32 to vector<8x128xf32>
    %31 = arith.mulf %30, %29 : vector<8x128xf32>
    %cst_25 = arith.constant 5.000000e-01 : f32
    %32 = vector.broadcast %cst_25 : f32 to vector<8x128xf32>
    %33 = arith.addf %31, %32 : vector<8x128xf32>
    %c0_26 = arith.constant 0 : index
    %c0_27 = arith.constant 0 : index
    %34 = vector.load %arg10[%c0_26, %c0_27] : memref<8x128xf32, #tpu.memory_space<vmem>>, vector<8x128xf32>
    tpu.vector_store %arg10[%c0_26, %c0_27], %33 {strides = array<i32>} : memref<8x128xf32, #tpu.memory_space<vmem>>, vector<8x128xf32>,
    return
  }
  func.func @transform_0(%arg0: i32) -> (i32, i32) {
    %c0_i32 = arith.constant 0 : i32
    %c0_i32_0 = arith.constant 0 : i32
    return %arg0, %c0_i32 : i32, i32
  }
  func.func @transform_1(%arg0: i32) -> (i32, i32) {
    %c0_i32 = arith.constant 0 : i32
    %c0_i32_0 = arith.constant 0 : i32
    %c0_i32_1 = arith.constant 0 : i32
    return %c0_i32, %c0_i32_0 : i32, i32
  }
  func.func @transform_2(%arg0: i32) -> (i32, i32) {
    %c0_i32 = arith.constant 0 : i32
    %c0_i32_0 = arith.constant 0 : i32
    %c0_i32_1 = arith.constant 0 : i32
    return %c0_i32, %c0_i32_0 : i32, i32
  }
  func.func @transform_3(%arg0: i32) -> (i32, i32) {
    %c0_i32 = arith.constant 0 : i32
    %c0_i32_0 = arith.constant 0 : i32
    %c0_i32_1 = arith.constant 0 : i32
    return %c0_i32, %c0_i32_0 : i32, i32
  }
  func.func @transform_4(%arg0: i32) -> (i32, i32) {
    %c0_i32 = arith.constant 0 : i32
    %c0_i32_0 = arith.constant 0 : i32
    %c0_i32_1 = arith.constant 0 : i32
    return %c0_i32, %c0_i32_0 : i32, i32
  }
  func.func @transform_5(%arg0: i32) -> (i32, i32) {
    %c0_i32 = arith.constant 0 : i32
    %c0_i32_0 = arith.constant 0 : i32
    %c0_i32_1 = arith.constant 0 : i32
    return %c0_i32, %c0_i32_0 : i32, i32
  }
  func.func @transform_6(%arg0: i32) -> (i32, i32) {
    %c0_i32 = arith.constant 0 : i32
    %c0_i32_0 = arith.constant 0 : i32
    %c0_i32_1 = arith.constant 0 : i32
    return %c0_i32, %c0_i32_0 : i32, i32
  }
  func.func @transform_7(%arg0: i32) -> (i32, i32) {
    %c0_i32 = arith.constant 0 : i32
    %c0_i32_0 = arith.constant 0 : i32
    %c0_i32_1 = arith.constant 0 : i32
    return %c0_i32, %c0_i32_0 : i32, i32
  }
  func.func @transform_8(%arg0: i32) -> (i32, i32) {
    %c0_i32 = arith.constant 0 : i32
    %c0_i32_0 = arith.constant 0 : i32
    %c0_i32_1 = arith.constant 0 : i32
    return %c0_i32, %c0_i32_0 : i32, i32
  }
  func.func @transform_9(%arg0: i32) -> (i32, i32) {
    %c0_i32 = arith.constant 0 : i32
    %c0_i32_0 = arith.constant 0 : i32
    return %arg0, %c0_i32 : i32, i32
  }
}

</mosaic_0001>

<bundles_post_ra>
// kernel: tpu_custom_call.1
= control target key start
LH: loop header
LB: loop body
LE: loop exit
PB: predicated region body
PF: predicated region fallthrough
CT: control target
= control target key end

     0   :  { %14 = vsyncpa [#allocation3], 0  ;;  %s1286_s0 = inlined_call_operand.vmem [shape: f32[12,128], index: 0, kind: input, shape index: {}]   ;;  %s1287_s1 = inlined_call_operand.vmem [shape: f32[128,40], index: 1, kind: input, shape index: {}]   ;;  %s1288_s2 = inlined_call_operand.vmem [shape: f32[1,40], index: 2, kind: input, shape index: {}]   ;;  %s1289_s3 = inlined_call_operand.vmem [shape: f32[40,8], index: 3, kind: input, shape index: {}]   ;;  %s1290_s4 = inlined_call_operand.vmem [shape: f32[1,8], index: 4, kind: input, shape index: {}]   ;;  %s1291_s5 = inlined_call_operand.vmem [shape: f32[8,40], index: 5, kind: input, shape index: {}]   ;;  %s1292_s6 = inlined_call_operand.vmem [shape: f32[1,40], index: 6, kind: input, shape index: {}]   ;;  %s1293_s7 = inlined_call_operand.vmem [shape: f32[40,128], index: 7, kind: input, shape index: {}]   ;;  %s1294_s8 = inlined_call_operand.vmem [shape: f32[1,128], index: 8, kind: input, shape index: {}]   ;;  %s1295_s9 = inlined_call_operand.hbm [shape: f32[12,128], index: 9, kind: output, shape index: {}]  }
   0x1   :  { %16 = vsyncpa [#allocation3 + $0x1], 0  ;;  %s1068_s30 = smov 0   ;;  %s1070_s10 = smov 0  }
   0x2   :  { %s1072_s11 = smov 0   ;;  %s1074_s12 = smov 0  }
   0x3 LB: > { %s1089_s13 = sadd.s32 4294967295, %s1012_s12   ;;  %s756_s14 = sadd.s32 4294967294, %s1012_s12   ;;  %s1012_s12 = sphi %s1074_s12, %s1301_s12   ;;  %s1008_s11 = sphi %s1072_s11, %s1300_s11   ;;  %s1004_s10 = sphi %s1070_s10, %s1299_s10   ;;  %s1000_s30 = sphi %s1068_s30, %s1298_s30  }
   0x4   : > { %s1093_s15 = sadd.s32 1, %s1012_s12   ;;  %s223_s16 = sadd.s32 1, %s1008_s11 }
   0x5   : > { %s220_s17 = ssub.s32 %s1012_s12, %s1093_s15  ;;  %p233_p0 = scmp.ne.s32.totalorder %s1008_s11, %s1004_s10 }
   0x6   : > { %p221_p1 = scmp.eq.s32.totalorder %s220_s17, 0  ;;  %p234_p2 = scmp.eq.s32.totalorder %s1089_s13, 1 }
   0x7   : > { %p239_p3 = scmp.ne.s32.totalorder %s1004_s10, %s1000_s30  ;;  %p240_p4 = scmp.eq.s32.totalorder %s756_s14, 1 }
   0x8   : > { %s1104_s18 = scalar_select %p221_p1, %s1008_s11, %s223_s16  }
   0x9   : > { %p1106_p5 = por %p234_p2, %p233_p0  ;;  %p1110_p6 = por %p240_p4, %p239_p3 }
   0xa   : > { %p759_p7 = scmp.ge.s32.totalorder %s1012_s12, 1  ;;  %p289_p8 = scmp.lt.s32.totalorder %s1012_s12, 3 }
   0xc   : > { %p290_p9 = pnand %p759_p7, %p289_p8 }
   0xd   : > { %v329_v0 = vld [vmem:[%s1287_s1] sm:$0xff] (!%p290_p9)  ;;  %v330_v1 = vld [vmem:[%s1287_s1 + $0x8] sm:$0xff] (!%p290_p9)  ;;  %v331_v2 = vld [vmem:[%s1287_s1 + $0x10] sm:$0xff] (!%p290_p9)  ;;  %v1014_v3 = vmov (!%p290_p9), 0.0|0.0   ;;  %vm1015_vm0 = vmmov (!%p290_p9), 0   ;;  %v1016_v6 = vmov (!%p290_p9), 0.0  }
   0xe   : > { %293 = sbr.rel (%p290_p9) target bundleno = 940 (0x3ac), region = 56  ;;  %870 = vmatprep.subr.bf16.mxu0 (!%p290_p9), %v1014_v3  ;;  %v871_v4 = vpack.c.bf16 (!%p290_p9), %v330_v1, %v329_v0  ;;  %v332_v5 = vld [vmem:[%s1287_s1 + $0x18] sm:$0xff] (!%p290_p9)  ;;  %836 = vmatprep.mubr.msk.f32.mxu0 (!%p290_p9), %vm1015_vm0, %v1016_v6  ;;  %v333_v8 = vld [vmem:[%s1287_s1 + $0x20] sm:$0xff] (!%p290_p9)  ;;  %v334_v9 = vld [vmem:[%s1287_s1 + $0x28] sm:$0xff] (!%p290_p9)  ;;  %p324_p10 = scmp.lt.s32.totalorder (!%p290_p9), %s1089_s13, 1  ;;  %vm435_vm1 = vcmask (!%p290_p9), 326656  }
   0xf   : > { %894 = vmatprep.subr.bf16.mxu1 (!%p290_p9), %v1014_v3  ;;  %849 = vmatprep.mubr.msk.f32.mxu1 (!%p290_p9), %vm1015_vm0, %v1016_v6  ;;  %v874_v7 = vpack.c.bf16 (!%p290_p9), %v332_v5, %v331_v2  ;;  %v423_v10 = vld [vmem:[%s1289_s3] sm:$0xff] (!%p290_p9)  ;;  %v424_v11 = vld [vmem:[%s1289_s3 + $0x8] sm:$0xff] (!%p290_p9)  ;;  %v877_v13 = vpack.c.bf16 (!%p290_p9), %v334_v9, %v333_v8  ;;  %v335_v14 = vld [vmem:[%s1287_s1 + $0x30] sm:$0xff] (!%p290_p9)  ;;  %vm518_vm2 = vcmask (!%p290_p9), 64512   ;;  %s321_s28 = sand.u32 (!%p290_p9), 1, %s1004_s10  }
  0x10   : > { %872 = vmatpush3.bf16.msra.mxu0 (!%p290_p9), %v871_v4  ;;  %v895_v12 = vpack.c.bf16 (!%p290_p9), %v424_v11, %v423_v10  ;;  %v336_v15 = vld [vmem:[%s1287_s1 + $0x38] sm:$0xff] (!%p290_p9)  ;;  %v337_v17 = vld [vmem:[%s1287_s1 + $0x40] sm:$0xff] (!%p290_p9)  ;;  %v338_v18 = vld [vmem:[%s1287_s1 + $0x48] sm:$0xff] (!%p290_p9)  ;;  %s760_s14 = sshll.u32 (!%p290_p9), %s321_s28, 3  ;;  %s684_s24 = scalar_lea.sflag (!%p290_p9), [#allocation3], %s321_s28 }
  0x11   : > { %873 = vmatprep.subr.bf16.mxu0 (!%p290_p9), %v1014_v3  ;;  %v880_v16 = vpack.c.bf16 (!%p290_p9), %v336_v15, %v335_v14  ;;  %v883_v19 = vpack.c.bf16 (!%p290_p9), %v338_v18, %v337_v17  ;;  %v339_v20 = vld [vmem:[%s1287_s1 + $0x50] sm:$0xff] (!%p290_p9)  ;;  %v340_v21 = vld [vmem:[%s1287_s1 + $0x58] sm:$0xff] (!%p290_p9)  ;;  %v341_v23 = vld [vmem:[%s1287_s1 + $0x60] sm:$0xff] (!%p290_p9)  ;;  %s323_s16 = scalar_lea.vmem (!%p290_p9), [#allocation2], %s760_s14 }
  0x12   : > { %896 = vmatpush3.bf16.msra.mxu1 (!%p290_p9), %v895_v12  ;;  %v886_v22 = vpack.c.bf16 (!%p290_p9), %v340_v21, %v339_v20  ;;  %v342_v24 = vld [vmem:[%s1287_s1 + $0x68] sm:$0xff] (!%p290_p9)  ;;  %v343_v26 = vld [vmem:[%s1287_s1 + $0x70] sm:$0xff] (!%p290_p9)  ;;  %v344_v27 = vld [vmem:[%s1287_s1 + $0x78] sm:$0xff] (!%p290_p9)  ;;  %s697_s17 = sshll.u32 (!%p290_p9), %s323_s16, 4  ;;  %s1246_s17 = int_to_ptr.vmem [resolvable:$true] %s697_s17 }
  0x13   : > { %897 = vmatprep.subr.bf16.mxu1 (!%p290_p9), %v1014_v3  ;;  %v889_v25 = vpack.c.bf16 (!%p290_p9), %v342_v24, %v341_v23  ;;  %v892_v28 = vpack.c.bf16 (!%p290_p9), %v344_v27, %v343_v26  ;;  %v425_v30 = vld [vmem:[%s1289_s3 + $0x10] sm:$0xff] (!%p290_p9)  ;;  %v426_v31 = vld [vmem:[%s1289_s3 + $0x18] sm:$0xff] (!%p290_p9)  ;;  %v427_v33 = vld [vmem:[%s1289_s3 + $0x20] sm:$0xff] (!%p290_p9) }
  0x14   : > { %875 = vmatpush3.bf16.msra.mxu0 (!%p290_p9), %v874_v7  ;;  %v898_v32 = vpack.c.bf16 (!%p290_p9), %v426_v31, %v425_v30  ;;  %v762_v34 = vld [vmem:[%s1288_s2] ss:$0 sm:$0xff] (!%p290_p9)  ;;  %v594_v42 = vld [vmem:[%s1293_s7 + $0x8] sm:$0xff] (!%p290_p9)  ;;  %v595_v48 = vld [vmem:[%s1293_s7 + $0x10] sm:$0xff] (!%p290_p9) }
  0x15   : > { %876 = vmatprep.subr.bf16.mxu0 %v1014_v3  ;;  %s325_s29 = scalar_select %p324_p10, %s1089_s13, 1  ;;  %v510_v39 = vld [vmem:[%s1291_s5] sm:$0xff]  ;;  %v596_v49 = vld [vmem:[%s1293_s7 + $0x18] sm:$0xff] }
  0x16   : > { %899 = vmatpush3.bf16.msra.mxu1 %v898_v32  ;;  %v763_v40 = vld [vmem:[%s1290_s4] ss:$0 sm:$0xff]  ;;  %v904_v50 = vpack.c.bf16 %v596_v49, %v595_v48 }
  0x17   : > { %s761_s22 = sshll.u32 %s325_s29, 3  ;;  %847 = vmatprep.subr.mxu1 %v1016_v6  ;;  %v593_v41 = vld [vmem:[%s1293_s7] sm:$0xff]  ;;  %s770_s29 = sshll.u32 %s1089_s13, 7 }
  0x18   : > { %878 = vmatpush3.bf16.msra.mxu0 %v877_v13  ;;  %s327_s25 = scalar_lea.vmem %s1286_s0, %s761_s22  ;;  %v901_v46 = vpack.c.bf16 %v594_v42, %v593_v41  ;;  %v597_v51 = vld [vmem:[%s1293_s7 + $0x20] sm:$0xff]  ;;  %s1244_s23 = scalar_lea.hbm %s1295_s9, %s770_s29 }
  0x19   : > { %879 = vmatprep.subr.bf16.mxu0 %v1014_v3  ;;  %v328_v29 = vld [vmem:[%s327_s25] sm:$0xff]  ;;  %s950_s25 = scalar_lea.vmem %s1246_s17, 128  ;;  %s1017_s13 = smov [#allocation2]  }
  0x1a   : > { %848 = vmatpush3.msra.mxu1 %v427_v33  ;;  %v765_v52 = vld [vmem:[%s1292_s6] ss:$0 sm:$0xff]  ;;  %p951_p11 = scmp.ne.s32.totalorder %s1246_s17, %s950_s25  ;;  %s954_s26 = sshll.u32 %s1017_s13, 4  ;;  %s955_s26 = int_to_ptr.vmem [resolvable:$false] %s954_s26 }
  0x1b   : > { %852 = vmatprep.subr.mxu1 %v1016_v6  ;;  %v767_v57 = vld [vmem:[%s1294_s8] ss:$0 sm:$0xff]  ;;  %s956_s27 = scalar_lea.vmem %s955_s26, 256  ;;  %p957_p0 = scmp.lt.s32.totalorder %s1246_s17, %s955_s26 }
  0x1c   : > { %881 = vmatpush3.bf16.msra.mxu0 %v880_v16  ;;  %p952_p12 = pnand %p951_p11, %p1106_p5  ;;  %p958_p1 = scmp.lt.s32.totalorder %s956_s27, %s950_s25 }
  0x1d   : > { %882 = vmatprep.subr.bf16.mxu0 %v1014_v3 }
  0x1e   : > { %p953_p13 = pneg %p952_p12  ;;  %p959_p2 = por %p958_p1, %p957_p0 }
  0x20   : > { %884 = vmatpush3.bf16.msra.mxu0 %v883_v19  ;;  %p960_p3 = pnand %p959_p2, %p953_p13 }
  0x21   : > { %885 = vmatprep.subr.bf16.mxu0 %v1014_v3 }
  0x24   : > { %887 = vmatpush3.bf16.msra.mxu0 %v886_v22 }
  0x25   : > { %888 = vmatprep.subr.bf16.mxu0 %v1014_v3 }
  0x28   : > { %890 = vmatpush3.bf16.msra.mxu0 %v889_v25 }
  0x29   : > { %891 = vmatprep.subr.bf16.mxu0 %v1014_v3 }
  0x2c   : > { %893 = vmatpush3.bf16.msra.mxu0 %v892_v28 }
  0x2f   : > { %837 = vmatmul.mubr.f32.vlgmr.msra.gmra.mrb[0].mxu0 %v328_v29 }
 0x102   : > { %v418_v35 = vpop.f32.mrb[0].mxu0 }
 0x103   : > { %v419_v36 = vadd.f32 %v762_v34, %v418_v35  ;;  %v838_v37 = vpop.f32.mrb[1].mxu0 }
 0x105   : > { %v422_v38 = vmax.f32 %v419_v36, 0.0 }
 0x107   : > { %850 = vmatmul.mubr.msk.f32.vlgmr.msra.gmra.mrb[0].mxu1 %vm435_vm1, %v422_v38 }
 0x108   : > { %854 = vmatprep.mubr.msk.f32.mxu1 %vm1015_vm0, %v1016_v6  ;;  %853 = vmatpush3.msra.mxu1 %v510_v39 }
 0x109   : > { %900 = vmatprep.subr.bf16.mxu1 %v1014_v3 }
 0x1da   : > { %v505_v43 = vpop.f32.mrb[0].mxu1 }
 0x1db   : > { %v506_v44 = vadd.f32 %v763_v40, %v505_v43  ;;  %v851_v45 = vpop.f32.mrb[1].mxu1 }
 0x1dd   : > { %v509_v47 = vmax.f32 %v506_v44, 0.0 }
 0x1df   : > { %855 = vmatmul.mubr.msk.f32.vlgmr.msra.gmra.mrb[2].mxu1 %vm518_vm2, %v509_v47 }
 0x1e0   : > { %902 = vmatpush3.bf16.msra.mxu1 %v901_v46  ;;  %867 = vmatprep.mubr.msk.f32.mxu1 %vm1015_vm0, %v1016_v6 }
 0x1e1   : > { %903 = vmatprep.subr.bf16.mxu1 %v1014_v3 }
 0x1e4   : > { %905 = vmatpush3.bf16.msra.mxu1 %v904_v50 }
 0x1e5   : > { %865 = vmatprep.subr.mxu1 %v1016_v6 }
 0x1e8   : > { %866 = vmatpush3.msra.mxu1 %v597_v51 }
 0x2b2   : > { %v588_v53 = vpop.f32.mrb[2].mxu1 }
 0x2b3   : > { %v589_v54 = vadd.f32 %v765_v52, %v588_v53  ;;  %v856_v55 = vpop.f32.mrb[3].mxu1 }
 0x2b5   : > { %v592_v56 = vmax.f32 %v589_v54, 0.0 }
 0x2b7   : > { %868 = vmatmul.mubr.msk.f32.vlgmr.msra.gmra.mrb[4].mxu1 %vm435_vm1, %v592_v56 }
 0x38a   : > { %v674_v58 = vpop.f32.mrb[4].mxu1 }
 0x38b   : > { %v675_v59 = vadd.f32 %v767_v57, %v674_v58  ;;  %v869_v60 = vpop.f32.mrb[5].mxu1 }
 0x38d   : > { %v678_v61 = vmul.f32 0.5, %v675_v59 }
 0x38f   : > { %948 = vtanh.f32 %v678_v61 }
 0x399   : > { %v949_v62 = vpop.eup %948 }
 0x39a   : > { %v680_v63 = vmul.f32 0.5, %v949_v62 }
 0x39c   : > { %v681_v0 = vadd.f32 0.5, %v680_v63 }
 0x39e   : > { %682 = vst [vmem:[%s323_s16] sm:$0xff] %v681_v0 }
 0x39f   : > { %963 = shalt.err (!%p960_p3)
}
 0x3a0   : > { %s964_s28 = scalar_lea.hbm %s1244_s23, 128  ;;  %s968_s16 = scalar_lea.hbm %s1295_s9, 256 }
 0x3a1   : > { %p965_p4 = scmp.ne.s32.totalorder %s1244_s23, %s964_s28  ;;  %p969_p9 = scmp.lt.u32.totalorder %s1244_s23, %s1295_s9 }
 0x3a2   : > { %p970_p10 = scmp.lt.u32.totalorder %s968_s16, %s964_s28  ;;  %p972_p12 = scmp.lt.u32.totalorder %s964_s28, %s1244_s23 }
 0x3a3   : > { %p966_p7 = pnand %p965_p4, %p1106_p5 }
 0x3a4   : > { %p971_p11 = por %p970_p10, %p969_p9 }
 0x3a5   : > { %p967_p8 = pneg %p966_p7 }
 0x3a6   : > { %p973_p13 = por %p972_p12, %p971_p11 }
 0x3a8   : > { %p974_p0 = pnand %p973_p13, %p967_p8 }
 0x3aa   : > { %977 = shalt.err (!%p974_p0)
}
 0x3ab   : > { %906 = dma.vmem_to_hbm [thread:$0]  (%p1106_p5), %s1246_s17, 128, %s1244_s23, %s684_s24  }
 0x3ac PF: > { %p912_p1 = scmp.ge.s32.totalorder %s1012_s12, 2  ;;  %s709_s25 = sand.u32 1, %s1000_s30  }
 0x3ad   : > { %s710_s13 = scalar_lea.sflag [#allocation3], %s709_s25 }
 0x3ae   : > { %p909_p2 = pnand %p912_p1, %p1110_p6 }
 0x3b0   : > { %995 = dma.done.wait (!%p909_p2), %s710_s13, 128  }
 0x3b1   : > { %997 = vsyncadd (!%p909_p2), %s710_s13, 4294967168  ;;  %p19_p3 = scmp.ge.s32.totalorder %s1093_s15, 4   ;;  %s1298_s30 = smov %s1004_s10 }
 0x3b2   : > { %s1299_s10 = smov %s1008_s11  ;;  %s1300_s11 = smov %s1104_s18 }
 0x3b3   : > { %s1301_s12 = smov %s1093_s15  ;;  %21 = sbr.rel (!%p19_p3) target bundleno = 3 (0x3), region = 91 }
 0x3ba   :  { %715 = vsyncpa [#allocation3], 1 }
 0x3bb   :  { %717 = vsyncpa [#allocation3 + $0x1], 1 }

</bundles_post_ra>
